<compile_context>
chip_gen: v5e
topology: v5e:2x2
jax: 0.10.0
libtpu: 0.0.40
codegen_flags: <defaults>
</compile_context>

<pallas_src>
import functools
import math

import jax
import jax.numpy as jnp
from jax.experimental import pallas as pl
from jax.experimental.pallas import tpu as pltpu

_NEG_INF = -1e9  # matches masked_fill(mask, -1000000000.0) in the reference module


def _round_up(n, m):
    return ((n + m - 1) // m) * m


def _vmem_limit(nbytes):
    # actual per-step block footprint + ~25% headroom, clamped to sane bounds
    # (64 MiB = v7x physical VMEM per TensorCore).
    return int(min(max(int(nbytes * 1.25), 4 << 20), 64 << 20))


# ---------------------------------------------------------------------------
# Linear projection kernel: y = x @ W + b, tiled over token rows.
# ---------------------------------------------------------------------------
def _linear_kernel(x_ref, w_ref, b_ref, o_ref):
    acc = jnp.dot(x_ref[...], w_ref[...], preferred_element_type=jnp.float32)
    o_ref[...] = (acc + b_ref[...]).astype(o_ref.dtype)


def _linear(x2d, w, b, *, tile_m=256):
    """x2d: (n_tokens, in_dim), w: (in_dim, out_dim), b: (out_dim,)."""
    n, k_dim = x2d.shape
    n_out = w.shape[1]

    # MXU-aligned row tile; shrink only if there are fewer tokens than a tile.
    tile_m = min(tile_m, _round_up(n, 8))
    n_pad = _round_up(n, tile_m)
    if n_pad != n:
        x2d = jnp.pad(x2d, ((0, n_pad - n), (0, 0)))  # pad once, no ragged block
    grid = (n_pad // tile_m,)
    b2d = b.reshape(1, n_out)

    itemsize = x2d.dtype.itemsize
    # double-buffered x/out tiles + resident W/b (+ f32 accumulator slack via headroom)
    vmem_bytes = (2 * tile_m * k_dim + 2 * k_dim * n_out + 2 * n_out
                  + 2 * tile_m * n_out) * itemsize
    cost = pl.CostEstimate(
        flops=2 * n_pad * k_dim * n_out,
        transcendentals=0,
        bytes_accessed=(n_pad * k_dim + k_dim * n_out + n_out + n_pad * n_out) * itemsize,
    )

    out = pl.pallas_call(
        _linear_kernel,
        out_shape=jax.ShapeDtypeStruct((n_pad, n_out), x2d.dtype),
        grid_spec=pltpu.PrefetchScalarGridSpec(
            num_scalar_prefetch=0,
            grid=grid,
            in_specs=[
                pl.BlockSpec((tile_m, k_dim), lambda i: (i, 0)),   # x rows
                pl.BlockSpec((k_dim, n_out), lambda i: (0, 0)),    # W (resident)
                pl.BlockSpec((1, n_out), lambda i: (0, 0)),        # b (resident)
            ],
            out_specs=pl.BlockSpec((tile_m, n_out), lambda i: (i, 0)),
        ),
        compiler_params=pltpu.CompilerParams(
            dimension_semantics=("parallel",),
            vmem_limit_bytes=_vmem_limit(vmem_bytes)),
        cost_estimate=cost,
    )(x2d, w, b2d)
    return out[:n]


# ---------------------------------------------------------------------------
# Scaled dot-product attention kernel (flash-style online softmax).
# ---------------------------------------------------------------------------
def _mha_attn_kernel(*refs, scale, with_bias):
    if with_bias:
        q_ref, k_ref, v_ref, bias_ref, o_ref, m_sc, l_sc, acc_sc = refs
    else:
        q_ref, k_ref, v_ref, o_ref, m_sc, l_sc, acc_sc = refs

    kv = pl.program_id(3)

    @pl.when(kv == 0)
    def _():
        m_sc[...] = jnp.full_like(m_sc, -jnp.inf)
        l_sc[...] = jnp.zeros_like(l_sc)
        acc_sc[...] = jnp.zeros_like(acc_sc)

    q = q_ref[0, 0]                                   # (tq, hd), native dtype
    k = k_ref[0, 0]                                   # (tk, hd)
    s = jnp.dot(q, k.T, preferred_element_type=jnp.float32) * scale   # (tq, tk) f32
    if with_bias:
        s = s + bias_ref[0]                           # additive -1e9 mask bias

    m_prev = m_sc[...]
    m_new = jnp.maximum(m_prev, s.max(axis=-1, keepdims=True))
    alpha = jnp.exp(m_prev - m_new)
    p = jnp.exp(s - m_new)
    l_sc[...] = alpha * l_sc[...] + p.sum(axis=-1, keepdims=True)
    acc_sc[...] = alpha * acc_sc[...] + jnp.dot(
        p.astype(v_ref.dtype), v_ref[0, 0], preferred_element_type=jnp.float32)
    m_sc[...] = m_new

    @pl.when(kv == pl.num_programs(3) - 1)
    def _():
        # dropout on p_attn is identity in eval mode
        o_ref[0, 0] = (acc_sc[...] / l_sc[...]).astype(o_ref.dtype)


def _scaled_dot_product_attention(q, k, v, bias=None, *, tile_q=256, tile_k=256):
    """q: (B, H, Sq, D); k, v: (B, H, Sk, D); bias: (B, Sq, Sk) additive f32 or None."""
    B, H, Sq, D = q.shape
    Sk = k.shape[2]
    tq = tile_q if Sq % tile_q == 0 else Sq   # full-dim block if seq not tileable
    tk = tile_k if Sk % tile_k == 0 else Sk
    grid = (B, H, Sq // tq, Sk // tk)
    scale = 1.0 / math.sqrt(D)

    in_specs = [
        pl.BlockSpec((1, 1, tq, D), lambda b, h, qi, ki: (b, h, qi, 0)),   # q
        pl.BlockSpec((1, 1, tk, D), lambda b, h, qi, ki: (b, h, ki, 0)),   # k
        pl.BlockSpec((1, 1, tk, D), lambda b, h, qi, ki: (b, h, ki, 0)),   # v
    ]
    inputs = [q, k, v]
    if bias is not None:
        in_specs.append(pl.BlockSpec((1, tq, tk), lambda b, h, qi, ki: (b, qi, ki)))
        inputs.append(bias)

    itemsize = q.dtype.itemsize
    vmem_bytes = (2 * (tq * D + 2 * tk * D + tq * D) * itemsize      # q/k/v/out bufs
                  + (2 * tq + tq * D) * 4                            # m, l, acc scratch
                  + (2 * tq * tk * 4 if bias is not None else 0))
    cost = pl.CostEstimate(
        flops=4 * B * H * Sq * Sk * D,
        transcendentals=B * H * Sq * Sk,
        bytes_accessed=(2 * q.size + k.size + v.size) * itemsize
                       + (bias.size * 4 if bias is not None else 0),
    )

    kernel = functools.partial(_mha_attn_kernel, scale=scale, with_bias=bias is not None)
    return pl.pallas_call(
        kernel,
        out_shape=jax.ShapeDtypeStruct((B, H, Sq, D), q.dtype),
        grid_spec=pltpu.PrefetchScalarGridSpec(
            num_scalar_prefetch=0,
            grid=grid,
            in_specs=in_specs,
            out_specs=pl.BlockSpec((1, 1, tq, D), lambda b, h, qi, ki: (b, h, qi, 0)),
            scratch_shapes=[
                pltpu.VMEM((tq, 1), jnp.float32),   # running max m
                pltpu.VMEM((tq, 1), jnp.float32),   # running denom l
                pltpu.VMEM((tq, D), jnp.float32),   # output accumulator
            ]),
        compiler_params=pltpu.CompilerParams(
            dimension_semantics=("parallel", "parallel", "parallel", "arbitrary"),
            vmem_limit_bytes=_vmem_limit(vmem_bytes)),
        cost_estimate=cost,
    )(*inputs)


# ---------------------------------------------------------------------------
# Full MultiHeadAttention forward.
# ---------------------------------------------------------------------------
def multi_head_attention(query, key, value, params, *, num_heads, mask=None,
                         tile_m=256, tile_q=256, tile_k=256):
    """query/key/value: (batch, seq, embed).
    params: dict wq,bq,wk,bk,wv,bv,wo,bo with weights stored (in_dim, out_dim)
    (i.e. the transpose of torch nn.Linear.weight).
    mask: optional (batch, seq_k, seq_q) bool, True = masked (torch semantics)."""
    batch, seq_q, embed = query.shape
    assert embed % num_heads == 0
    head_dim = embed // num_heads

    def proj(x, w, b):
        n = x.shape[1]
        y = _linear(x.reshape(batch * n, embed), w, b, tile_m=tile_m)
        return y.reshape(batch, n, num_heads, head_dim).transpose(0, 2, 1, 3)

    q = proj(query, params["wq"], params["bq"])
    k = proj(key, params["wk"], params["bk"])
    v = proj(value, params["wv"], params["bv"])

    bias = None
    if mask is not None:
        # torch: mask.unsqueeze(1).permute(0,1,3,2) -> (batch, 1, seq_q, seq_k),
        # then masked_fill(mask, -1e9).  Carried here as an additive bias shared
        # by all heads.
        bias = jnp.where(jnp.swapaxes(mask, -1, -2), _NEG_INF, 0.0).astype(jnp.float32)

    ctx = _scaled_dot_product_attention(q, k, v, bias, tile_q=tile_q, tile_k=tile_k)
    ctx = ctx.transpose(0, 2, 1, 3).reshape(batch * seq_q, embed)
    out = _linear(ctx, params["wo"], params["bo"], tile_m=tile_m)
    return out.reshape(batch, seq_q, embed)


def init_params(key, embed_dim, dtype=jnp.float32):
    """nn.Linear-style init (uniform +-1/sqrt(fan_in)); weights as (in, out)."""
    keys = jax.random.split(key, 8)
    lim = 1.0 / math.sqrt(embed_dim)

    def lin(kw, kb):
        w = jax.random.uniform(kw, (embed_dim, embed_dim), dtype, -lim, lim)
        b = jax.random.uniform(kb, (embed_dim,), dtype, -lim, lim)
        return w, b

    wq, bq = lin(keys[0], keys[1])
    wk, bk = lin(keys[2], keys[3])
    wv, bv = lin(keys[4], keys[5])
    wo, bo = lin(keys[6], keys[7])
    return dict(wq=wq, bq=bq, wk=wk, bk=bk, wv=wv, bv=bv, wo=wo, bo=bo)


def _reference_mha(query, key, value, params, *, num_heads, mask=None):
    """Pure-JAX reference mirroring the PyTorch module (eval mode)."""
    batch, seq_q, embed = query.shape
    head_dim = embed // num_heads

    def proj(x, w, b):
        y = x @ w + b
        return y.reshape(batch, -1, num_heads, head_dim).transpose(0, 2, 1, 3)

    q = proj(query, params["wq"], params["bq"])
    k = proj(key, params["wk"], params["bk"])
    v = proj(value, params["wv"], params["bv"])
    scores = jnp.einsum("bhqd,bhkd->bhqk", q, k) / math.sqrt(head_dim)
    if mask is not None:
        m = jnp.swapaxes(mask, -1, -2)[:, None]           # (B, 1, Sq, Sk)
        scores = jnp.where(m, _NEG_INF, scores)
    p = jax.nn.softmax(scores, axis=-1)
    ctx = jnp.einsum("bhqk,bhkd->bhqd", p, v)
    ctx = ctx.transpose(0, 2, 1, 3).reshape(batch, seq_q, embed)
    return ctx @ params["wo"] + params["bo"]


if __name__ == "__main__":
    batch, seq, embed_dim, num_heads = 2, 8, 32, 4
    pdropout = 0.1  # eval mode -> dropout is identity

    key = jax.random.PRNGKey(0)
    kq, kk, kv, kp = jax.random.split(key, 4)
    query = jax.random.normal(kq, (batch, seq, embed_dim), jnp.float32)
    key_in = jax.random.normal(kk, (batch, seq, embed_dim), jnp.float32)
    value = jax.random.normal(kv, (batch, seq, embed_dim), jnp.float32)
    params = init_params(kp, embed_dim)

    # --- unmasked path ---
    out = multi_head_attention(query, key_in, value, params, num_heads=num_heads)
    out = jax.block_until_ready(out)
    ref = _reference_mha(query, key_in, value, params, num_heads=num_heads)
    assert out.shape == (batch, seq, embed_dim)
    assert jnp.allclose(out, ref, atol=1e-3, rtol=1e-3), \
        float(jnp.max(jnp.abs(out - ref)))

    # --- masked path (torch-layout mask: (batch, seq_k, seq_q), True = masked) ---
    k_idx = jnp.arange(seq)[:, None]
    q_idx = jnp.arange(seq)[None, :]
    mask = jnp.broadcast_to(k_idx > q_idx, (batch, seq, seq))  # causal after module permute
    out_m = multi_head_attention(query, key_in, value, params,
                                 num_heads=num_heads, mask=mask)
    out_m = jax.block_until_ready(out_m)
    ref_m = _reference_mha(query, key_in, value, params, num_heads=num_heads, mask=mask)
    assert jnp.allclose(out_m, ref_m, atol=1e-3, rtol=1e-3), \
        float(jnp.max(jnp.abs(out_m - ref_m)))

    print("KERNEL_OK")
</pallas_src>

<mosaic_0001>
module attributes {stable_mosaic.version = 11 : i64} {
  func.func @_linear_kernel(%arg0: i32, %arg1: memref<16x32xf32, #tpu.memory_space<vmem>>, %arg2: memref<32x32xf32, #tpu.memory_space<vmem>>, %arg3: memref<1x32xf32, #tpu.memory_space<vmem>>, %arg4: memref<16x32xf32, #tpu.memory_space<vmem>>) attributes {dimension_semantics = [#tpu.dimension_semantics<parallel>], iteration_bounds = array<i64: 1>, scalar_prefetch = 0 : i64, scratch_operands = 0 : i64, tpu.core_type = #tpu.core_type<tc>, window_params = [{transform_indices = @transform_0, window_bounds = array<i64: 16, 32>}, {pipeline_mode = #tpu.pipeline_mode<synchronous>, transform_indices = @transform_1, window_bounds = array<i64: 32, 32>}, {pipeline_mode = #tpu.pipeline_mode<synchronous>, transform_indices = @transform_2, window_bounds = array<i64: 1, 32>}, {transform_indices = @transform_3, window_bounds = array<i64: 16, 32>}]} {
    %c0 = arith.constant 0 : index
    %c0_0 = arith.constant 0 : index
    %0 = vector.load %arg1[%c0, %c0_0] : memref<16x32xf32, #tpu.memory_space<vmem>>, vector<16x32xf32>
    %c0_1 = arith.constant 0 : index
    %c0_2 = arith.constant 0 : index
    %1 = vector.load %arg2[%c0_1, %c0_2] : memref<32x32xf32, #tpu.memory_space<vmem>>, vector<32x32xf32>
    %cst = arith.constant dense<0.000000e+00> : vector<16x32xf32>
    %2 = tpu.matmul %0, %1, %cst {dimension_numbers = #tpu.dot_dimension_numbers<[1], [0], [0], [1], [0, 0, 1, 1], [], []>} : vector<16x32xf32>, vector<32x32xf32>, vector<16x32xf32> -> vector<16x32xf32>
    %c0_3 = arith.constant 0 : index
    %c0_4 = arith.constant 0 : index
    %3 = vector.load %arg3[%c0_3, %c0_4] : memref<1x32xf32, #tpu.memory_space<vmem>>, vector<1x32xf32>
    %4 = vector.broadcast %3 : vector<1x32xf32> to vector<16x32xf32>
    %5 = arith.addf %2, %4 : vector<16x32xf32>
    %c0_5 = arith.constant 0 : index
    %c0_6 = arith.constant 0 : index
    %6 = vector.load %arg4[%c0_5, %c0_6] : memref<16x32xf32, #tpu.memory_space<vmem>>, vector<16x32xf32>
    tpu.vector_store %arg4[%c0_5, %c0_6], %5 {strides = array<i32>} : memref<16x32xf32, #tpu.memory_space<vmem>>, vector<16x32xf32>,
    return
  }
  func.func @transform_0(%arg0: i32) -> (i32, i32) {
    %c0_i32 = arith.constant 0 : i32
    %c0_i32_0 = arith.constant 0 : i32
    return %arg0, %c0_i32 : i32, i32
  }
  func.func @transform_1(%arg0: i32) -> (i32, i32) {
    %c0_i32 = arith.constant 0 : i32
    %c0_i32_0 = arith.constant 0 : i32
    %c0_i32_1 = arith.constant 0 : i32
    return %c0_i32, %c0_i32_0 : i32, i32
  }
  func.func @transform_2(%arg0: i32) -> (i32, i32) {
    %c0_i32 = arith.constant 0 : i32
    %c0_i32_0 = arith.constant 0 : i32
    %c0_i32_1 = arith.constant 0 : i32
    return %c0_i32, %c0_i32_0 : i32, i32
  }
  func.func @transform_3(%arg0: i32) -> (i32, i32) {
    %c0_i32 = arith.constant 0 : i32
    %c0_i32_0 = arith.constant 0 : i32
    return %arg0, %c0_i32 : i32, i32
  }
}

</mosaic_0001>

<bundles_post_ra>
// kernel: tpu_custom_call.1
= control target key start
LH: loop header
LB: loop body
LE: loop exit
PB: predicated region body
PF: predicated region fallthrough
CT: control target
= control target key end

     0   :  { %8 = vsyncpa [#allocation3], 0  ;;  %s249_s0 = inlined_call_operand.hbm [shape: f32[16,32], index: 0, kind: input, shape index: {}]   ;;  %s250_s1 = inlined_call_operand.hbm [shape: f32[32,32], index: 1, kind: input, shape index: {}]   ;;  %s251_s2 = inlined_call_operand.vmem [shape: f32[1,32], index: 2, kind: input, shape index: {}]   ;;  %s252_s3 = inlined_call_operand.hbm [shape: f32[16,32], index: 3, kind: output, shape index: {}]  }
   0x1   :  { %9 = vsyncpa [#allocation6], 0 }
   0x2   :  { %10 = vsyncpa [#allocation4], 0  ;;  %s15_s14 = sshll.u32 %s249_s0, 4  ;;  %s199_s15 = smov [#allocation2]   ;;  %s16_s14 = int_to_ptr.hbm [resolvable:$true] %s15_s14 }
   0x3   :  { %s17_s16 = sshll.u32 %s199_s15, 4  ;;  %s28_s19 = sshll.u32 %s250_s1, 4  ;;  %s18_s16 = int_to_ptr.vmem [resolvable:$true] %s17_s16  ;;  %s29_s19 = int_to_ptr.hbm [resolvable:$true] %s28_s19 }
   0x4   :  { %s200_s20 = smov 128   ;;  %s201_s21 = smov 8  }
   0x5   :  { %23 = dma.hbm_to_vmem [thread:$0]  %s16_s14, 256, %s18_s16, [#allocation3], %s200_s20, %s200_s20, %s201_s21  }
   0x6   :  { %s202_s22 = smov [#allocation5]  }
   0x7   :  { %s30_s23 = sshll.u32 %s202_s22, 4  ;;  %s31_s23 = int_to_ptr.vmem [resolvable:$true] %s30_s23 }
   0x8   :  { %36 = dma.hbm_to_vmem [thread:$0]  %s29_s19, 512, %s31_s23, [#allocation6], %s200_s20, %s200_s20, %s201_s21  }
   0x9   :  { %193 = dma.done.wait [#allocation3], 256  }
   0xa   :  { %194 = vsyncadd [#allocation3], 4294967040 }
   0xb   :  { %195 = dma.done.wait [#allocation6], 512  }
   0xc   :  { %196 = vsyncadd [#allocation6], 4294966784  ;;  %v52_v0 = vld [vmem:[#allocation5 + $0x18] sm:$0xff]  ;;  %v51_v1 = vld [vmem:[#allocation5 + $0x10] sm:$0xff]  ;;  %vm57_vm0 = vcmask 261120   ;;  %s203_s24 = smov [#allocation7]  }
   0xd   :  { %76 = vmatpush.msra.mxu0 %v52_v0  ;;  %111 = vmatpush.msra.mxu1 %v52_v0  ;;  %v50_v2 = vld [vmem:[#allocation5 + $0x8] sm:$0xff]  ;;  %v49_v3 = vld [vmem:[#allocation5] sm:$0xff]  ;;  %v47_v4 = vld [vmem:[#allocation2] sm:$0xff]  ;;  %s93_s25 = sshll.u32 %s203_s24, 4  ;;  %s95_s28 = sshll.u32 %s252_s3, 4  ;;  %s94_s25 = int_to_ptr.vmem [resolvable:$true] %s93_s25  ;;  %s96_s28 = int_to_ptr.hbm [resolvable:$true] %s95_s28 }
   0xe   :  { %v48_v5 = vld [vmem:[#allocation2 + $0x8] sm:$0xff]  ;;  %v120_v6 = vld [vmem:[%s251_s2] ss:$0 sm:$0xff] }
   0xf   :  { %77 = vmatpush.msra.mxu0 %v51_v1  ;;  %112 = vmatpush.msra.mxu1 %v51_v1 }
  0x11   :  { %78 = vmatpush.msra.mxu0 %v50_v2  ;;  %113 = vmatpush.msra.mxu1 %v50_v2 }
  0x13   :  { %79 = vmatpush.msra.mxu0 %v49_v3  ;;  %114 = vmatpush.msra.mxu1 %v49_v3 }
  0x14   :  { %109 = vmatmul.msk.f32.vlgmr.msra.gmra.mxu0 %vm57_vm0, %v47_v4  ;;  %110 = vmatmul.msk.f32.vlgmr.msra.gmra.mxu1 %vm57_vm0, %v48_v5 }
  0x91   :  { %v81_v7 = vpop.f32.mrf.mxu0  ;;  %v84_v8 = vpop.f32.mrf.mxu1 }
  0x92   :  { %v82_v9 = vadd.f32 %v120_v6, %v81_v7  ;;  %v85_v10 = vadd.f32 %v120_v6, %v84_v8 }
  0x94   :  { %87 = vst.msk [vmem:[#allocation7] sm:$0xff] %vm57_vm0, %v82_v9 }
  0x95   :  { %88 = vst.msk [vmem:[#allocation7 + $0x8] sm:$0xff] %vm57_vm0, %v85_v10 }
  0x96   :  { %101 = dma.vmem_to_hbm [thread:$0]  %s94_s25, 256, %s96_s28, [#allocation4], %s200_s20, %s200_s20, %s201_s21  }
  0x97   :  { %197 = dma.done.wait [#allocation4], 256  }
  0x98   :  { %198 = vsyncadd [#allocation4], 4294967040 }
  0x99   :  { %106 = vsyncpa [#allocation3], 1 }
  0x9a   :  { %107 = vsyncpa [#allocation6], 1 }
  0x9b   :  { %108 = vsyncpa [#allocation4], 1 }

</bundles_post_ra>
